<compile_context>
chip_gen: v7x
topology: tpu7x:2x2x1
jax: 0.10.0
libtpu: 0.0.40
codegen_flags: <defaults>
</compile_context>

<pallas_src>
import functools
import math

import jax
import jax.numpy as jnp
from jax import lax
from jax.experimental import pallas as pl
from jax.experimental.pallas import tpu as pltpu


_INV_SQRT2 = 1.0 / math.sqrt(2.0)
_LN_EPS = 1e-5   # PyTorch nn.LayerNorm default


def _round_up(x, m):
    return ((x + m - 1) // m) * m


def _row_tile(M, pref=256):
    """Sublane-aligned row tile and padded row count."""
    tm = max(8, _round_up(min(pref, _round_up(M, 8)), 8))
    return tm, _round_up(M, tm)


# ---------------------------------------------------------------------------------
# LayerNorm kernel
# ---------------------------------------------------------------------------------
def _layernorm_kernel(x_ref, g_ref, b_ref, o_ref, *, eps):
    x = x_ref[...].astype(jnp.float32)
    mean = jnp.mean(x, axis=-1, keepdims=True)
    xc = x - mean
    var = jnp.mean(xc * xc, axis=-1, keepdims=True)
    y = xc * lax.rsqrt(var + eps) * g_ref[...].astype(jnp.float32) \
        + b_ref[...].astype(jnp.float32)
    o_ref[...] = y.astype(o_ref.dtype)


def layernorm(x2d, gamma, beta, eps=_LN_EPS, tm_pref=256):
    """LayerNorm over the last dim of a (M, D) array."""
    M, D = x2d.shape
    tm, Mp = _row_tile(M, tm_pref)
    xp = x2d if Mp == M else jnp.zeros((Mp, D), x2d.dtype).at[:M].set(x2d)
    g = gamma.reshape(1, D)
    b = beta.reshape(1, D)
    out = pl.pallas_call(
        functools.partial(_layernorm_kernel, eps=eps),
        out_shape=jax.ShapeDtypeStruct((Mp, D), x2d.dtype),
        grid_spec=pltpu.PrefetchScalarGridSpec(
            num_scalar_prefetch=0,
            grid=(Mp // tm,),
            in_specs=[
                pl.BlockSpec((tm, D), lambda i: (i, 0)),
                pl.BlockSpec((1, D), lambda i: (0, 0)),
                pl.BlockSpec((1, D), lambda i: (0, 0)),
            ],
            out_specs=pl.BlockSpec((tm, D), lambda i: (i, 0)),
        ),
        compiler_params=pltpu.CompilerParams(dimension_semantics=("parallel",)),
    )(xp, g, b)
    return out[:M]


# ---------------------------------------------------------------------------------
# Linear (x @ W + b) kernel
# ---------------------------------------------------------------------------------
def _linear_kernel(x_ref, w_ref, b_ref, o_ref):
    acc = jnp.dot(x_ref[...], w_ref[...], preferred_element_type=jnp.float32)
    o_ref[...] = (acc + b_ref[...].astype(jnp.float32)).astype(o_ref.dtype)


def linear(x2d, w, b, tm_pref=256):
    """(M, K) @ (K, N) + b, lane-dense padded to 128 on K and N."""
    M, K = x2d.shape
    Kw, N = w.shape
    assert K == Kw
    tm, Mp = _row_tile(M, tm_pref)
    Kp = _round_up(K, 128)
    Np = _round_up(N, 128)
    xp = jnp.zeros((Mp, Kp), x2d.dtype).at[:M, :K].set(x2d)
    wp = jnp.zeros((Kp, Np), w.dtype).at[:K, :N].set(w)
    bp = jnp.zeros((1, Np), jnp.float32).at[:, :N].set(
        b.reshape(1, N).astype(jnp.float32))
    out = pl.pallas_call(
        _linear_kernel,
        out_shape=jax.ShapeDtypeStruct((Mp, Np), x2d.dtype),
        grid_spec=pltpu.PrefetchScalarGridSpec(
            num_scalar_prefetch=0,
            grid=(Mp // tm,),
            in_specs=[
                pl.BlockSpec((tm, Kp), lambda i: (i, 0)),
                pl.BlockSpec((Kp, Np), lambda i: (0, 0)),
                pl.BlockSpec((1, Np), lambda i: (0, 0)),
            ],
            out_specs=pl.BlockSpec((tm, Np), lambda i: (i, 0)),
        ),
        compiler_params=pltpu.CompilerParams(dimension_semantics=("parallel",)),
    )(xp, wp, bp)
    return out[:M, :N]


# ---------------------------------------------------------------------------------
# Fused multi-head attention core: softmax(q k^T * scale) @ v, one (b, h) per step
# ---------------------------------------------------------------------------------
def _attn_kernel(q_ref, k_ref, v_ref, o_ref, *, scale):
    q = q_ref[...].astype(jnp.float32)          # (N, Dh)
    k = k_ref[...].astype(jnp.float32)
    v = v_ref[...].astype(jnp.float32)
    s = lax.dot_general(q, k, (((1,), (1,)), ((), ())),
                        preferred_element_type=jnp.float32) * scale
    s = s - jnp.max(s, axis=-1, keepdims=True)
    e = jnp.exp(s)
    p = e / jnp.sum(e, axis=-1, keepdims=True)
    o_ref[...] = jnp.dot(p, v, preferred_element_type=jnp.float32).astype(o_ref.dtype)


def mha_core(q, k, v, scale):
    """q, k, v: (B*H, N, Dh) -> (B*H, N, Dh)."""
    BH, N, Dh = q.shape
    return pl.pallas_call(
        functools.partial(_attn_kernel, scale=scale),
        out_shape=jax.ShapeDtypeStruct((BH, N, Dh), q.dtype),
        grid_spec=pltpu.PrefetchScalarGridSpec(
            num_scalar_prefetch=0,
            grid=(BH,),
            in_specs=[
                pl.BlockSpec((None, N, Dh), lambda i: (i, 0, 0)),
                pl.BlockSpec((None, N, Dh), lambda i: (i, 0, 0)),
                pl.BlockSpec((None, N, Dh), lambda i: (i, 0, 0)),
            ],
            out_specs=pl.BlockSpec((None, N, Dh), lambda i: (i, 0, 0)),
        ),
        compiler_params=pltpu.CompilerParams(dimension_semantics=("parallel",)),
    )(q, k, v)


def attention(x, wqkv, wo, bo, heads, dim_head):
    """Full Attention module: QKV proj (no bias) -> SDPA -> output proj."""
    B, N, D = x.shape
    inner = heads * dim_head
    qkv = linear(x.reshape(B * N, D), wqkv, jnp.zeros((3 * inner,), jnp.float32))
    qkv = qkv.reshape(B, N, 3, heads, dim_head)
    q = qkv[:, :, 0].transpose(0, 2, 1, 3).reshape(B * heads, N, dim_head)
    k = qkv[:, :, 1].transpose(0, 2, 1, 3).reshape(B * heads, N, dim_head)
    v = qkv[:, :, 2].transpose(0, 2, 1, 3).reshape(B * heads, N, dim_head)
    o = mha_core(q, k, v, dim_head ** -0.5)
    o = o.reshape(B, heads, N, dim_head).transpose(0, 2, 1, 3).reshape(B * N, inner)
    o = linear(o, wo, bo)
    return o.reshape(B, N, D)


# ---------------------------------------------------------------------------------
# Fused FeedForward: Linear -> GELU -> Linear with f32 accumulator, hidden tiled
# ---------------------------------------------------------------------------------
def _ffn_kernel(x_ref, w1_ref, b1_ref, w2_ref, b2_ref, o_ref, acc_ref):
    k = pl.program_id(1)

    @pl.when(k == 0)
    def _init():
        acc_ref[...] = jnp.zeros_like(acc_ref)

    h = jnp.dot(x_ref[...], w1_ref[...], preferred_element_type=jnp.float32)
    h = h + b1_ref[...].astype(jnp.float32)
    # Exact GELU (PyTorch nn.GELU default), f32.
    h = 0.5 * h * (1.0 + lax.erf(h * _INV_SQRT2))
    acc_ref[...] += jnp.dot(h.astype(w2_ref.dtype), w2_ref[...],
                            preferred_element_type=jnp.float32)

    @pl.when(k == pl.num_programs(1) - 1)
    def _finalize():
        o_ref[...] = (acc_ref[...] + b2_ref[...].astype(jnp.float32)).astype(o_ref.dtype)


def feed_forward(x, w1, b1, w2, b2, tm=256, th=512, compute_dtype=None):
    """x: (B, N, D); w1: (D, H); b1: (H,); w2: (H, D); b2: (D,)."""
    B, N, D = x.shape
    H = w1.shape[1]
    out_dtype = x.dtype
    if compute_dtype is None:
        compute_dtype = x.dtype
    cbytes = jnp.dtype(compute_dtype).itemsize

    b1 = jnp.reshape(b1, (1, H)).astype(jnp.float32)
    b2 = jnp.reshape(b2, (1, D)).astype(jnp.float32)

    M = B * N
    Dp = _round_up(D, 128)
    Hp = _round_up(H, 128)
    tm = max(16, _round_up(min(tm, _round_up(M, 16)), 16))
    Mp = _round_up(M, tm)
    th = math.gcd(Hp, _round_up(min(th, Hp), 128))
    n_m, n_h = Mp // tm, Hp // th

    x2d = x.reshape(M, D)
    xp = jnp.zeros((Mp, Dp), compute_dtype).at[:M, :D].set(x2d.astype(compute_dtype))
    w1p = jnp.zeros((Dp, Hp), compute_dtype).at[:D, :H].set(w1.astype(compute_dtype))
    w2p = jnp.zeros((Hp, Dp), compute_dtype).at[:H, :D].set(w2.astype(compute_dtype))
    b1p = jnp.zeros((1, Hp), jnp.float32).at[:, :H].set(b1)
    b2p = jnp.zeros((1, Dp), jnp.float32).at[:, :D].set(b2)

    est = (2 * tm * Dp * cbytes + 2 * tm * Dp * 4
           + 2 * (Dp * th + th * Dp) * cbytes + 2 * (th + Dp) * 4 + tm * Dp * 4)
    vmem_limit = int(min(max(2 * est + (2 << 20), 8 << 20), 64 << 20))

    out = pl.pallas_call(
        _ffn_kernel,
        out_shape=jax.ShapeDtypeStruct((Mp, Dp), out_dtype),
        grid_spec=pltpu.PrefetchScalarGridSpec(
            num_scalar_prefetch=0,
            grid=(n_m, n_h),
            in_specs=[
                pl.BlockSpec((tm, Dp), lambda i, k: (i, 0)),
                pl.BlockSpec((Dp, th), lambda i, k: (0, k)),
                pl.BlockSpec((1, th), lambda i, k: (0, k)),
                pl.BlockSpec((th, Dp), lambda i, k: (k, 0)),
                pl.BlockSpec((1, Dp), lambda i, k: (0, 0)),
            ],
            out_specs=pl.BlockSpec((tm, Dp), lambda i, k: (i, 0)),
            scratch_shapes=[pltpu.VMEM((tm, Dp), jnp.float32)],
        ),
        compiler_params=pltpu.CompilerParams(
            dimension_semantics=("parallel", "arbitrary"),
            vmem_limit_bytes=vmem_limit,
        ),
    )(xp, w1p, b1p, w2p, b2p)

    return out[:M, :D].reshape(B, N, D)


# ---------------------------------------------------------------------------------
# Plain-JAX reference ops (ground truth for correctness checks)
# ---------------------------------------------------------------------------------
def ref_layernorm(x, g, b, eps=_LN_EPS):
    m = x.mean(-1, keepdims=True)
    v = ((x - m) ** 2).mean(-1, keepdims=True)
    return (x - m) / jnp.sqrt(v + eps) * g + b


def ref_linear(x, w, b):
    return x @ w + b


def ref_attention(x, wqkv, wo, bo, heads, dim_head):
    B, N, _ = x.shape
    inner = heads * dim_head
    qkv = (x @ wqkv).reshape(B, N, 3, heads, dim_head)
    q, k, v = (qkv[:, :, i].transpose(0, 2, 1, 3) for i in range(3))
    s = jnp.einsum("bhnd,bhmd->bhnm", q, k) * (dim_head ** -0.5)
    p = jax.nn.softmax(s, axis=-1)
    o = jnp.einsum("bhnm,bhmd->bhnd", p, v)
    o = o.transpose(0, 2, 1, 3).reshape(B, N, inner)
    return o @ wo + bo


def ref_ffn(x, w1, b1, w2, b2):
    h = x @ w1 + b1
    h = 0.5 * h * (1.0 + lax.erf(h * _INV_SQRT2))
    return h @ w2 + b2


# ---------------------------------------------------------------------------------
# Shared ViTSpatialSpectral_V1 forward (layout ops in JAX; compute via `ops`)
# ---------------------------------------------------------------------------------
def vit_forward(img, params, cfg, ops):
    ln, lin, attn, ffn = ops["ln"], ops["linear"], ops["attn"], ops["ffn"]
    b = img.shape[0]
    c = cfg["num_spectral_patches"]
    hsp = wsp = cfg["num_spatial_patches"]
    p0, p1, p2 = cfg["patch_depth"], cfg["patch_height"], cfg["patch_width"]
    dim = cfg["dim"]
    heads, dim_head = cfg["heads"], cfg["dim_head"]
    patch_dim = p0 * p1 * p2

    # 'b (c p0) (h p1) (w p2) -> b (c h w) (p0 p1 p2)'   (layout only)
    x = img.reshape(b, c, p0, hsp, p1, wsp, p2)
    x = x.transpose(0, 1, 3, 5, 2, 4, 6).reshape(b, c * hsp * wsp, patch_dim)
    n = x.shape[1]

    # patch embedding: LN -> Linear -> LN
    x2 = x.reshape(b * n, patch_dim)
    x2 = ln(x2, params["pe_ln0_g"], params["pe_ln0_b"])
    x2 = lin(x2, params["pe_w"], params["pe_b"])
    x2 = ln(x2, params["pe_ln1_g"], params["pe_ln1_b"])
    x = x2.reshape(b, n, dim)

    # positional embedding + dropout(p=0)
    x = x + params["pos_emb"][:, :n]

    def run_transformer(x, layers):
        for lyr in layers:
            B, N, D = x.shape
            h = ln(x.reshape(B * N, D), lyr["ln1_g"], lyr["ln1_b"]).reshape(B, N, D)
            x = attn(h, lyr["wqkv"], lyr["wo"], lyr["bo"], heads, dim_head) + x
            h = ln(x.reshape(B * N, D), lyr["ln2_g"], lyr["ln2_b"]).reshape(B, N, D)
            x = ffn(h, lyr["w1"], lyr["b1"], lyr["w2"], lyr["b2"]) + x
        return x

    # spatial transformer: 'b (c h w) d -> (b c) (h w) d'
    x = x.reshape(b * c, hsp * wsp, dim)
    x = run_transformer(x, params["t1"])
    # spectral transformer: '(b c) (h w) d -> (b h w) c d'
    x = x.reshape(b, c, hsp * wsp, dim).transpose(0, 2, 1, 3).reshape(b * hsp * wsp, c, dim)
    x = run_transformer(x, params["t2"])
    # '(b h w) c d -> b (c h w) d'
    x = x.reshape(b, hsp * wsp, c, dim).transpose(0, 2, 1, 3).reshape(b, c * hsp * wsp, dim)

    # 'b (c h w) d -> b c h w d'; mean pool over spectral patches
    x = x.reshape(b, c, hsp, wsp, dim).mean(axis=1)

    # mlp_head: LN -> Linear -> Rearrange -> MoveAxis
    nc = cfg["num_classes"]
    x2 = x.reshape(b * hsp * wsp, dim)
    x2 = ln(x2, params["head_ln_g"], params["head_ln_b"])
    x2 = lin(x2, params["head_w"], params["head_b"])
    x = x2.reshape(b, hsp, wsp, p1, p2, nc)
    x = x.transpose(0, 1, 3, 2, 4, 5).reshape(b, hsp * p1, wsp * p2, nc)
    return jnp.moveaxis(x, -1, 1)
    # TODO(synk): Dropout layers have p=0.0 (identity); einops rearranges /
    # residual adds / mean pooling remain plain JAX layout ops.


# ---------------------------------------------------------------------------------
# Synthetic parameters
# ---------------------------------------------------------------------------------
def init_params(key, cfg):
    dim, mlp = cfg["dim"], cfg["mlp_dim"]
    heads, dim_head = cfg["heads"], cfg["dim_head"]
    inner = heads * dim_head
    patch_dim = cfg["patch_depth"] * cfg["patch_height"] * cfg["patch_width"]
    nc = cfg["num_classes"]
    num_patches = cfg["num_spectral_patches"] * cfg["num_spatial_patches"] ** 2
    head_out = nc * cfg["patch_height"] * cfg["patch_width"]

    it = iter(jax.random.split(key, 128))

    def rnd(shape, scale):
        return scale * jax.random.normal(next(it), shape, jnp.float32)

    def ln_pair(d):
        return 1.0 + rnd((d,), 0.05), rnd((d,), 0.05)

    def layer():
        lg1, lb1 = ln_pair(dim)
        lg2, lb2 = ln_pair(dim)
        return dict(
            ln1_g=lg1, ln1_b=lb1,
            wqkv=rnd((dim, 3 * inner), dim ** -0.5),
            wo=rnd((inner, dim), inner ** -0.5), bo=rnd((dim,), 0.02),
            ln2_g=lg2, ln2_b=lb2,
            w1=rnd((dim, mlp), dim ** -0.5), b1=rnd((mlp,), 0.02),
            w2=rnd((mlp, dim), mlp ** -0.5), b2=rnd((dim,), 0.02),
        )

    pe_g0, pe_b0 = ln_pair(patch_dim)
    pe_g1, pe_b1 = ln_pair(dim)
    hg, hb = ln_pair(dim)
    return dict(
        pe_ln0_g=pe_g0, pe_ln0_b=pe_b0,
        pe_w=rnd((patch_dim, dim), patch_dim ** -0.5), pe_b=rnd((dim,), 0.02),
        pe_ln1_g=pe_g1, pe_ln1_b=pe_b1,
        pos_emb=rnd((1, num_patches + 1, dim), 0.02),
        t1=[layer() for _ in range(cfg["depth"])],
        t2=[layer() for _ in range(cfg["depth"])],
        head_ln_g=hg, head_ln_b=hb,
        head_w=rnd((dim, head_out), dim ** -0.5),
        head_b=rnd((head_out,), 0.02),
    )


# ---------------------------------------------------------------------------------
if __name__ == "__main__":
    cfg = dict(
        image_size=8, channels=4,
        patch_height=4, patch_width=4, patch_depth=2,
        num_spatial_patches=2, num_spectral_patches=2,
        dim=32, depth=1, heads=2, dim_head=16, mlp_dim=64,
        num_classes=3,
    )
    key = jax.random.PRNGKey(0)
    kimg, kparam = jax.random.split(key)
    batch = 2
    img = jax.random.normal(
        kimg, (batch, cfg["channels"], cfg["image_size"], cfg["image_size"]), jnp.float32)
    params = init_params(kparam, cfg)

    pallas_ops = dict(ln=layernorm, linear=linear, attn=attention, ffn=feed_forward)
    ref_ops = dict(ln=ref_layernorm, linear=ref_linear, attn=ref_attention, ffn=ref_ffn)

    fwd_pallas = jax.jit(lambda im, pr: vit_forward(im, pr, cfg, pallas_ops))
    fwd_ref = jax.jit(lambda im, pr: vit_forward(im, pr, cfg, ref_ops))

    out = jax.block_until_ready(fwd_pallas(img, params))
    ref = jax.block_until_ready(fwd_ref(img, params))

    expected_shape = (batch, cfg["num_classes"], cfg["image_size"], cfg["image_size"])
    assert out.shape == expected_shape, out.shape
    max_diff = float(jnp.max(jnp.abs(out - ref)))
    assert jnp.allclose(out, ref, atol=2e-3, rtol=2e-3), f"mismatch vs reference: {max_diff}"

    print("KERNEL_OK")
</pallas_src>

<mosaic_0001>
module attributes {stable_mosaic.version = 11 : i64} {
  func.func @_layernorm_kernel(%arg0: i32, %arg1: memref<16x32xf32, #tpu.memory_space<vmem>>, %arg2: memref<1x32xf32, #tpu.memory_space<vmem>>, %arg3: memref<1x32xf32, #tpu.memory_space<vmem>>, %arg4: memref<16x32xf32, #tpu.memory_space<vmem>>) attributes {dimension_semantics = [#tpu.dimension_semantics<parallel>], iteration_bounds = array<i64: 1>, scalar_prefetch = 0 : i64, scratch_operands = 0 : i64, tpu.core_type = #tpu.core_type<tc>, window_params = [{transform_indices = @transform_0, window_bounds = array<i64: 16, 32>}, {pipeline_mode = #tpu.pipeline_mode<synchronous>, transform_indices = @transform_1, window_bounds = array<i64: 1, 32>}, {pipeline_mode = #tpu.pipeline_mode<synchronous>, transform_indices = @transform_2, window_bounds = array<i64: 1, 32>}, {transform_indices = @transform_3, window_bounds = array<i64: 16, 32>}]} {
    %c0 = arith.constant 0 : index
    %c0_0 = arith.constant 0 : index
    %0 = vector.load %arg1[%c0, %c0_0] : memref<16x32xf32, #tpu.memory_space<vmem>>, vector<16x32xf32>
    %cst = arith.constant dense<0.000000e+00> : vector<16xf32>
    %1 = vector.multi_reduction <add>, %0, %cst [1] : vector<16x32xf32> to vector<16xf32>
    %2 = vector.shape_cast %1 : vector<16xf32> to vector<16x1xf32>
    %cst_1 = arith.constant 3.200000e+01 : f32
    %3 = vector.broadcast %cst_1 : f32 to vector<16x1xf32>
    %4 = arith.divf %2, %3 : vector<16x1xf32>
    %5 = vector.broadcast %4 : vector<16x1xf32> to vector<16x32xf32>
    %6 = arith.subf %0, %5 : vector<16x32xf32>
    %7 = arith.mulf %6, %6 : vector<16x32xf32>
    %cst_2 = arith.constant dense<0.000000e+00> : vector<16xf32>
    %8 = vector.multi_reduction <add>, %7, %cst_2 [1] : vector<16x32xf32> to vector<16xf32>
    %9 = vector.shape_cast %8 : vector<16xf32> to vector<16x1xf32>
    %cst_3 = arith.constant 3.200000e+01 : f32
    %10 = vector.broadcast %cst_3 : f32 to vector<16x1xf32>
    %11 = arith.divf %9, %10 : vector<16x1xf32>
    %cst_4 = arith.constant 9.99999974E-6 : f32
    %12 = vector.broadcast %cst_4 : f32 to vector<16x1xf32>
    %13 = arith.addf %11, %12 : vector<16x1xf32>
    %14 = math.rsqrt %13 : vector<16x1xf32>
    %15 = vector.broadcast %14 : vector<16x1xf32> to vector<16x32xf32>
    %16 = arith.mulf %6, %15 : vector<16x32xf32>
    %c0_5 = arith.constant 0 : index
    %c0_6 = arith.constant 0 : index
    %17 = vector.load %arg2[%c0_5, %c0_6] : memref<1x32xf32, #tpu.memory_space<vmem>>, vector<1x32xf32>
    %18 = vector.broadcast %17 : vector<1x32xf32> to vector<16x32xf32>
    %19 = arith.mulf %16, %18 : vector<16x32xf32>
    %c0_7 = arith.constant 0 : index
    %c0_8 = arith.constant 0 : index
    %20 = vector.load %arg3[%c0_7, %c0_8] : memref<1x32xf32, #tpu.memory_space<vmem>>, vector<1x32xf32>
    %21 = vector.broadcast %20 : vector<1x32xf32> to vector<16x32xf32>
    %22 = arith.addf %19, %21 : vector<16x32xf32>
    %c0_9 = arith.constant 0 : index
    %c0_10 = arith.constant 0 : index
    %23 = vector.load %arg4[%c0_9, %c0_10] : memref<16x32xf32, #tpu.memory_space<vmem>>, vector<16x32xf32>
    tpu.vector_store %arg4[%c0_9, %c0_10], %22 {strides = array<i32>} : memref<16x32xf32, #tpu.memory_space<vmem>>, vector<16x32xf32>,
    return
  }
  func.func @transform_0(%arg0: i32) -> (i32, i32) {
    %c0_i32 = arith.constant 0 : i32
    %c0_i32_0 = arith.constant 0 : i32
    return %arg0, %c0_i32 : i32, i32
  }
  func.func @transform_1(%arg0: i32) -> (i32, i32) {
    %c0_i32 = arith.constant 0 : i32
    %c0_i32_0 = arith.constant 0 : i32
    %c0_i32_1 = arith.constant 0 : i32
    return %c0_i32, %c0_i32_0 : i32, i32
  }
  func.func @transform_2(%arg0: i32) -> (i32, i32) {
    %c0_i32 = arith.constant 0 : i32
    %c0_i32_0 = arith.constant 0 : i32
    %c0_i32_1 = arith.constant 0 : i32
    return %c0_i32, %c0_i32_0 : i32, i32
  }
  func.func @transform_3(%arg0: i32) -> (i32, i32) {
    %c0_i32 = arith.constant 0 : i32
    %c0_i32_0 = arith.constant 0 : i32
    return %arg0, %c0_i32 : i32, i32
  }
}

module attributes {stable_mosaic.version = 11 : i64} {
  func.func @_linear_kernel(%arg0: i32, %arg1: memref<16x128xf32, #tpu.memory_space<vmem>>, %arg2: memref<128x128xf32, #tpu.memory_space<vmem>>, %arg3: memref<1x128xf32, #tpu.memory_space<vmem>>, %arg4: memref<16x128xf32, #tpu.memory_space<vmem>>) attributes {dimension_semantics = [#tpu.dimension_semantics<parallel>], iteration_bounds = array<i64: 1>, scalar_prefetch = 0 : i64, scratch_operands = 0 : i64, tpu.core_type = #tpu.core_type<tc>, window_params = [{transform_indices = @transform_0, window_bounds = array<i64: 16, 128>}, {pipeline_mode = #tpu.pipeline_mode<synchronous>, transform_indices = @transform_1, window_bounds = array<i64: 128, 128>}, {pipeline_mode = #tpu.pipeline_mode<synchronous>, transform_indices = @transform_2, window_bounds = array<i64: 1, 128>}, {transform_indices = @transform_3, window_bounds = array<i64: 16, 128>}]} {
    %c0 = arith.constant 0 : index
    %c0_0 = arith.constant 0 : index
    %0 = vector.load %arg1[%c0, %c0_0] : memref<16x128xf32, #tpu.memory_space<vmem>>, vector<16x128xf32>
    %c0_1 = arith.constant 0 : index
    %c0_2 = arith.constant 0 : index
    %1 = vector.load %arg2[%c0_1, %c0_2] : memref<128x128xf32, #tpu.memory_space<vmem>>, vector<128x128xf32>
    %cst = arith.constant dense<0.000000e+00> : vector<16x128xf32>
    %2 = tpu.matmul %0, %1, %cst {dimension_numbers = #tpu.dot_dimension_numbers<[1], [0], [0], [1], [0, 0, 1, 1], [], []>} : vector<16x128xf32>, vector<128x128xf32>, vector<16x128xf32> -> vector<16x128xf32>
    %c0_3 = arith.constant 0 : index
    %c0_4 = arith.constant 0 : index
    %3 = vector.load %arg3[%c0_3, %c0_4] : memref<1x128xf32, #tpu.memory_space<vmem>>, vector<1x128xf32>
    %4 = vector.broadcast %3 : vector<1x128xf32> to vector<16x128xf32>
    %5 = arith.addf %2, %4 : vector<16x128xf32>
    %c0_5 = arith.constant 0 : index
    %c0_6 = arith.constant 0 : index
    %6 = vector.load %arg4[%c0_5, %c0_6] : memref<16x128xf32, #tpu.memory_space<vmem>>, vector<16x128xf32>
    tpu.vector_store %arg4[%c0_5, %c0_6], %5 {strides = array<i32>} : memref<16x128xf32, #tpu.memory_space<vmem>>, vector<16x128xf32>,
    return
  }
  func.func @transform_0(%arg0: i32) -> (i32, i32) {
    %c0_i32 = arith.constant 0 : i32
    %c0_i32_0 = arith.constant 0 : i32
    return %arg0, %c0_i32 : i32, i32
  }
  func.func @transform_1(%arg0: i32) -> (i32, i32) {
    %c0_i32 = arith.constant 0 : i32
    %c0_i32_0 = arith.constant 0 : i32
    %c0_i32_1 = arith.constant 0 : i32
    return %c0_i32, %c0_i32_0 : i32, i32
  }
  func.func @transform_2(%arg0: i32) -> (i32, i32) {
    %c0_i32 = arith.constant 0 : i32
    %c0_i32_0 = arith.constant 0 : i32
    %c0_i32_1 = arith.constant 0 : i32
    return %c0_i32, %c0_i32_0 : i32, i32
  }
  func.func @transform_3(%arg0: i32) -> (i32, i32) {
    %c0_i32 = arith.constant 0 : i32
    %c0_i32_0 = arith.constant 0 : i32
    return %arg0, %c0_i32 : i32, i32
  }
}

module attributes {stable_mosaic.version = 11 : i64} {
  func.func @_attn_kernel(%arg0: i32, %arg1: memref<1x4x16xf32, #tpu.memory_space<vmem>>, %arg2: memref<1x4x16xf32, #tpu.memory_space<vmem>>, %arg3: memref<1x4x16xf32, #tpu.memory_space<vmem>>, %arg4: memref<1x4x16xf32, #tpu.memory_space<vmem>>) attributes {dimension_semantics = [#tpu.dimension_semantics<parallel>], iteration_bounds = array<i64: 8>, scalar_prefetch = 0 : i64, scratch_operands = 0 : i64, tpu.core_type = #tpu.core_type<tc>, window_params = [{transform_indices = @transform_0, window_bounds = array<i64: 1, 4, 16>}, {transform_indices = @transform_1, window_bounds = array<i64: 1, 4, 16>}, {transform_indices = @transform_2, window_bounds = array<i64: 1, 4, 16>}, {transform_indices = @transform_3, window_bounds = array<i64: 1, 4, 16>}]} {
    %c0 = arith.constant 0 : index
    %c0_0 = arith.constant 0 : index
    %c0_1 = arith.constant 0 : index
    %0 = vector.load %arg1[%c0, %c0_0, %c0_1] : memref<1x4x16xf32, #tpu.memory_space<vmem>>, vector<1x4x16xf32>
    %1 = vector.shape_cast %0 : vector<1x4x16xf32> to vector<4x16xf32>
    %c0_2 = arith.constant 0 : index
    %c0_3 = arith.constant 0 : index
    %c0_4 = arith.constant 0 : index
    %2 = vector.load %arg2[%c0_2, %c0_3, %c0_4] : memref<1x4x16xf32, #tpu.memory_space<vmem>>, vector<1x4x16xf32>
    %3 = vector.shape_cast %2 : vector<1x4x16xf32> to vector<4x16xf32>
    %c0_5 = arith.constant 0 : index
    %c0_6 = arith.constant 0 : index
    %c0_7 = arith.constant 0 : index
    %4 = vector.load %arg3[%c0_5, %c0_6, %c0_7] : memref<1x4x16xf32, #tpu.memory_space<vmem>>, vector<1x4x16xf32>
    %5 = vector.shape_cast %4 : vector<1x4x16xf32> to vector<4x16xf32>
    %cst = arith.constant dense<0.000000e+00> : vector<4x4xf32>
    %6 = tpu.matmul %1, %3, %cst {dimension_numbers = #tpu.dot_dimension_numbers<[1], [1], [0], [0], [0, 0, 1, 0], [], []>} : vector<4x16xf32>, vector<4x16xf32>, vector<4x4xf32> -> vector<4x4xf32>
    %cst_8 = arith.constant 2.500000e-01 : f32
    %7 = vector.broadcast %cst_8 : f32 to vector<4x4xf32>
    %8 = arith.mulf %6, %7 : vector<4x4xf32>
    %cst_9 = arith.constant dense<0xFF800000> : vector<4xf32>
    %9 = vector.multi_reduction <maximumf>, %8, %cst_9 [1] : vector<4x4xf32> to vector<4xf32>
    %10 = vector.shape_cast %9 : vector<4xf32> to vector<4x1xf32>
    %11 = vector.broadcast %10 : vector<4x1xf32> to vector<4x4xf32>
    %12 = arith.subf %8, %11 : vector<4x4xf32>
    %13 = math.exp %12 : vector<4x4xf32>
    %cst_10 = arith.constant dense<0.000000e+00> : vector<4xf32>
    %14 = vector.multi_reduction <add>, %13, %cst_10 [1] : vector<4x4xf32> to vector<4xf32>
    %15 = vector.shape_cast %14 : vector<4xf32> to vector<4x1xf32>
    %16 = vector.broadcast %15 : vector<4x1xf32> to vector<4x4xf32>
    %17 = arith.divf %13, %16 : vector<4x4xf32>
    %cst_11 = arith.constant dense<0.000000e+00> : vector<4x16xf32>
    %18 = tpu.matmul %17, %5, %cst_11 {dimension_numbers = #tpu.dot_dimension_numbers<[1], [0], [0], [1], [0, 0, 1, 1], [], []>} : vector<4x4xf32>, vector<4x16xf32>, vector<4x16xf32> -> vector<4x16xf32>
    %c0_12 = arith.constant 0 : index
    %c0_13 = arith.constant 0 : index
    %c0_14 = arith.constant 0 : index
    %19 = vector.load %arg4[%c0_12, %c0_13, %c0_14] : memref<1x4x16xf32, #tpu.memory_space<vmem>>, vector<1x4x16xf32>
    %20 = vector.shape_cast %19 : vector<1x4x16xf32> to vector<4x16xf32>
    %21 = vector.shape_cast %18 : vector<4x16xf32> to vector<1x4x16xf32>
    tpu.vector_store %arg4[%c0_12, %c0_13, %c0_14], %21 {strides = array<i32>} : memref<1x4x16xf32, #tpu.memory_space<vmem>>, vector<1x4x16xf32>,
    return
  }
  func.func @transform_0(%arg0: i32) -> (i32, i32, i32) {
    %c0_i32 = arith.constant 0 : i32
    %c0_i32_0 = arith.constant 0 : i32
    %c0_i32_1 = arith.constant 0 : i32
    return %arg0, %c0_i32, %c0_i32_0 : i32, i32, i32
  }
  func.func @transform_1(%arg0: i32) -> (i32, i32, i32) {
    %c0_i32 = arith.constant 0 : i32
    %c0_i32_0 = arith.constant 0 : i32
    %c0_i32_1 = arith.constant 0 : i32
    return %arg0, %c0_i32, %c0_i32_0 : i32, i32, i32
  }
  func.func @transform_2(%arg0: i32) -> (i32, i32, i32) {
    %c0_i32 = arith.constant 0 : i32
    %c0_i32_0 = arith.constant 0 : i32
    %c0_i32_1 = arith.constant 0 : i32
    return %arg0, %c0_i32, %c0_i32_0 : i32, i32, i32
  }
  func.func @transform_3(%arg0: i32) -> (i32, i32, i32) {
    %c0_i32 = arith.constant 0 : i32
    %c0_i32_0 = arith.constant 0 : i32
    %c0_i32_1 = arith.constant 0 : i32
    return %arg0, %c0_i32, %c0_i32_0 : i32, i32, i32
  }
}

module attributes {stable_mosaic.version = 11 : i64} {
  func.func @_ffn_kernel(%arg0: i32, %arg1: i32, %arg2: memref<16x128xf32, #tpu.memory_space<vmem>>, %arg3: memref<128x128xf32, #tpu.memory_space<vmem>>, %arg4: memref<1x128xf32, #tpu.memory_space<vmem>>, %arg5: memref<128x128xf32, #tpu.memory_space<vmem>>, %arg6: memref<1x128xf32, #tpu.memory_space<vmem>>, %arg7: memref<16x128xf32, #tpu.memory_space<vmem>>, %arg8: memref<16x128xf32, #tpu.memory_space<vmem>>) attributes {dimension_semantics = [#tpu.dimension_semantics<parallel>, #tpu.dimension_semantics<arbitrary>], iteration_bounds = array<i64: 1, 1>, scalar_prefetch = 0 : i64, scratch_operands = 1 : i64, tpu.core_type = #tpu.core_type<tc>, window_params = [{transform_indices = @transform_0, window_bounds = array<i64: 16, 128>}, {transform_indices = @transform_1, window_bounds = array<i64: 128, 128>}, {transform_indices = @transform_2, window_bounds = array<i64: 1, 128>}, {transform_indices = @transform_3, window_bounds = array<i64: 128, 128>}, {pipeline_mode = #tpu.pipeline_mode<synchronous>, transform_indices = @transform_4, window_bounds = array<i64: 1, 128>}, {transform_indices = @transform_5, window_bounds = array<i64: 16, 128>}]} {
    %c0_i32 = arith.constant 0 : i32
    %0 = arith.cmpi eq, %arg1, %c0_i32 : i32
    %1 = arith.extui %0 : i1 to i32
    %c0_i32_0 = arith.constant 0 : i32
    %2 = arith.cmpi ne, %1, %c0_i32_0 : i32
    scf.if %2 {
      %cst_18 = arith.constant 0.000000e+00 : f32
      %25 = vector.broadcast %cst_18 : f32 to vector<16x128xf32>
      %c0_19 = arith.constant 0 : index
      %c0_20 = arith.constant 0 : index
      %26 = vector.load %arg8[%c0_19, %c0_20] : memref<16x128xf32, #tpu.memory_space<vmem>>, vector<16x128xf32>
      tpu.vector_store %arg8[%c0_19, %c0_20], %25 {strides = array<i32>} : memref<16x128xf32, #tpu.memory_space<vmem>>, vector<16x128xf32>,
    } else {
    }
    %c0 = arith.constant 0 : index
    %c0_1 = arith.constant 0 : index
    %3 = vector.load %arg2[%c0, %c0_1] : memref<16x128xf32, #tpu.memory_space<vmem>>, vector<16x128xf32>
    %c0_2 = arith.constant 0 : index
    %c0_3 = arith.constant 0 : index
    %4 = vector.load %arg3[%c0_2, %c0_3] : memref<128x128xf32, #tpu.memory_space<vmem>>, vector<128x128xf32>
    %cst = arith.constant dense<0.000000e+00> : vector<16x128xf32>
    %5 = tpu.matmul %3, %4, %cst {dimension_numbers = #tpu.dot_dimension_numbers<[1], [0], [0], [1], [0, 0, 1, 1], [], []>} : vector<16x128xf32>, vector<128x128xf32>, vector<16x128xf32> -> vector<16x128xf32>
    %c0_4 = arith.constant 0 : index
    %c0_5 = arith.constant 0 : index
    %6 = vector.load %arg4[%c0_4, %c0_5] : memref<1x128xf32, #tpu.memory_space<vmem>>, vector<1x128xf32>
    %7 = vector.broadcast %6 : vector<1x128xf32> to vector<16x128xf32>
    %8 = arith.addf %5, %7 : vector<16x128xf32>
    %cst_6 = arith.constant 5.000000e-01 : f32
    %9 = vector.broadcast %cst_6 : f32 to vector<16x128xf32>
    %10 = arith.mulf %9, %8 : vector<16x128xf32>
    %cst_7 = arith.constant 0.707106769 : f32
    %11 = vector.broadcast %cst_7 : f32 to vector<16x128xf32>
    %12 = arith.mulf %8, %11 : vector<16x128xf32>
    %13 = math.erf %12 : vector<16x128xf32>
    %cst_8 = arith.constant 1.000000e+00 : f32
    %14 = vector.broadcast %cst_8 : f32 to vector<16x128xf32>
    %15 = arith.addf %14, %13 : vector<16x128xf32>
    %16 = arith.mulf %10, %15 : vector<16x128xf32>
    %c0_9 = arith.constant 0 : index
    %c0_10 = arith.constant 0 : index
    %17 = vector.load %arg8[%c0_9, %c0_10] : memref<16x128xf32, #tpu.memory_space<vmem>>, vector<16x128xf32>
    %c0_11 = arith.constant 0 : index
    %c0_12 = arith.constant 0 : index
    %18 = vector.load %arg5[%c0_11, %c0_12] : memref<128x128xf32, #tpu.memory_space<vmem>>, vector<128x128xf32>
    %cst_13 = arith.constant dense<0.000000e+00> : vector<16x128xf32>
    %19 = tpu.matmul %16, %18, %cst_13 {dimension_numbers = #tpu.dot_dimension_numbers<[1], [0], [0], [1], [0, 0, 1, 1], [], []>} : vector<16x128xf32>, vector<128x128xf32>, vector<16x128xf32> -> vector<16x128xf32>
    %20 = arith.addf %17, %19 : vector<16x128xf32>
    %c0_14 = arith.constant 0 : index
    %c0_15 = arith.constant 0 : index
    %21 = vector.load %arg8[%c0_14, %c0_15] : memref<16x128xf32, #tpu.memory_space<vmem>>, vector<16x128xf32>
    tpu.vector_store %arg8[%c0_14, %c0_15], %20 {strides = array<i32>} : memref<16x128xf32, #tpu.memory_space<vmem>>, vector<16x128xf32>,
    %c0_i32_16 = arith.constant 0 : i32
    %22 = arith.cmpi eq, %arg1, %c0_i32_16 : i32
    %23 = arith.extui %22 : i1 to i32
    %c0_i32_17 = arith.constant 0 : i32
    %24 = arith.cmpi ne, %23, %c0_i32_17 : i32
    scf.if %24 {
      %c0_18 = arith.constant 0 : index
      %c0_19 = arith.constant 0 : index
      %25 = vector.load %arg8[%c0_18, %c0_19] : memref<16x128xf32, #tpu.memory_space<vmem>>, vector<16x128xf32>
      %c0_20 = arith.constant 0 : index
      %c0_21 = arith.constant 0 : index
      %26 = vector.load %arg6[%c0_20, %c0_21] : memref<1x128xf32, #tpu.memory_space<vmem>>, vector<1x128xf32>
      %27 = vector.broadcast %26 : vector<1x128xf32> to vector<16x128xf32>
      %28 = arith.addf %25, %27 : vector<16x128xf32>
      %c0_22 = arith.constant 0 : index
      %c0_23 = arith.constant 0 : index
      %29 = vector.load %arg7[%c0_22, %c0_23] : memref<16x128xf32, #tpu.memory_space<vmem>>, vector<16x128xf32>
      tpu.vector_store %arg7[%c0_22, %c0_23], %28 {strides = array<i32>} : memref<16x128xf32, #tpu.memory_space<vmem>>, vector<16x128xf32>,
    } else {
    }
    return
  }
  func.func @transform_0(%arg0: i32, %arg1: i32) -> (i32, i32) {
    %c0_i32 = arith.constant 0 : i32
    %c0_i32_0 = arith.constant 0 : i32
    return %arg0, %c0_i32 : i32, i32
  }
  func.func @transform_1(%arg0: i32, %arg1: i32) -> (i32, i32) {
    %c0_i32 = arith.constant 0 : i32
    %c0_i32_0 = arith.constant 0 : i32
    return %c0_i32, %arg1 : i32, i32
  }
  func.func @transform_2(%arg0: i32, %arg1: i32) -> (i32, i32) {
    %c0_i32 = arith.constant 0 : i32
    %c0_i32_0 = arith.constant 0 : i32
    return %c0_i32, %arg1 : i32, i32
  }
  func.func @transform_3(%arg0: i32, %arg1: i32) -> (i32, i32) {
    %c0_i32 = arith.constant 0 : i32
    %c0_i32_0 = arith.constant 0 : i32
    return %arg1, %c0_i32 : i32, i32
  }
  func.func @transform_4(%arg0: i32, %arg1: i32) -> (i32, i32) {
    %c0_i32 = arith.constant 0 : i32
    %c0_i32_0 = arith.constant 0 : i32
    %c0_i32_1 = arith.constant 0 : i32
    return %c0_i32, %c0_i32_0 : i32, i32
  }
  func.func @transform_5(%arg0: i32, %arg1: i32) -> (i32, i32) {
    %c0_i32 = arith.constant 0 : i32
    %c0_i32_0 = arith.constant 0 : i32
    return %arg0, %c0_i32 : i32, i32
  }
}

module attributes {stable_mosaic.version = 11 : i64} {
  func.func @_attn_kernel(%arg0: i32, %arg1: memref<1x2x16xf32, #tpu.memory_space<vmem>>, %arg2: memref<1x2x16xf32, #tpu.memory_space<vmem>>, %arg3: memref<1x2x16xf32, #tpu.memory_space<vmem>>, %arg4: memref<1x2x16xf32, #tpu.memory_space<vmem>>) attributes {dimension_semantics = [#tpu.dimension_semantics<parallel>], iteration_bounds = array<i64: 16>, scalar_prefetch = 0 : i64, scratch_operands = 0 : i64, tpu.core_type = #tpu.core_type<tc>, window_params = [{transform_indices = @transform_0, window_bounds = array<i64: 1, 2, 16>}, {transform_indices = @transform_1, window_bounds = array<i64: 1, 2, 16>}, {transform_indices = @transform_2, window_bounds = array<i64: 1, 2, 16>}, {transform_indices = @transform_3, window_bounds = array<i64: 1, 2, 16>}]} {
    %c0 = arith.constant 0 : index
    %c0_0 = arith.constant 0 : index
    %c0_1 = arith.constant 0 : index
    %0 = vector.load %arg1[%c0, %c0_0, %c0_1] : memref<1x2x16xf32, #tpu.memory_space<vmem>>, vector<1x2x16xf32>
    %1 = vector.shape_cast %0 : vector<1x2x16xf32> to vector<2x16xf32>
    %c0_2 = arith.constant 0 : index
    %c0_3 = arith.constant 0 : index
    %c0_4 = arith.constant 0 : index
    %2 = vector.load %arg2[%c0_2, %c0_3, %c0_4] : memref<1x2x16xf32, #tpu.memory_space<vmem>>, vector<1x2x16xf32>
    %3 = vector.shape_cast %2 : vector<1x2x16xf32> to vector<2x16xf32>
    %c0_5 = arith.constant 0 : index
    %c0_6 = arith.constant 0 : index
    %c0_7 = arith.constant 0 : index
    %4 = vector.load %arg3[%c0_5, %c0_6, %c0_7] : memref<1x2x16xf32, #tpu.memory_space<vmem>>, vector<1x2x16xf32>
    %5 = vector.shape_cast %4 : vector<1x2x16xf32> to vector<2x16xf32>
    %cst = arith.constant dense<0.000000e+00> : vector<2x2xf32>
    %6 = tpu.matmul %1, %3, %cst {dimension_numbers = #tpu.dot_dimension_numbers<[1], [1], [0], [0], [0, 0, 1, 0], [], []>} : vector<2x16xf32>, vector<2x16xf32>, vector<2x2xf32> -> vector<2x2xf32>
    %cst_8 = arith.constant 2.500000e-01 : f32
    %7 = vector.broadcast %cst_8 : f32 to vector<2x2xf32>
    %8 = arith.mulf %6, %7 : vector<2x2xf32>
    %cst_9 = arith.constant dense<0xFF800000> : vector<2xf32>
    %9 = vector.multi_reduction <maximumf>, %8, %cst_9 [1] : vector<2x2xf32> to vector<2xf32>
    %10 = vector.shape_cast %9 : vector<2xf32> to vector<2x1xf32>
    %11 = vector.broadcast %10 : vector<2x1xf32> to vector<2x2xf32>
    %12 = arith.subf %8, %11 : vector<2x2xf32>
    %13 = math.exp %12 : vector<2x2xf32>
    %cst_10 = arith.constant dense<0.000000e+00> : vector<2xf32>
    %14 = vector.multi_reduction <add>, %13, %cst_10 [1] : vector<2x2xf32> to vector<2xf32>
    %15 = vector.shape_cast %14 : vector<2xf32> to vector<2x1xf32>
    %16 = vector.broadcast %15 : vector<2x1xf32> to vector<2x2xf32>
    %17 = arith.divf %13, %16 : vector<2x2xf32>
    %cst_11 = arith.constant dense<0.000000e+00> : vector<2x16xf32>
    %18 = tpu.matmul %17, %5, %cst_11 {dimension_numbers = #tpu.dot_dimension_numbers<[1], [0], [0], [1], [0, 0, 1, 1], [], []>} : vector<2x2xf32>, vector<2x16xf32>, vector<2x16xf32> -> vector<2x16xf32>
    %c0_12 = arith.constant 0 : index
    %c0_13 = arith.constant 0 : index
    %c0_14 = arith.constant 0 : index
    %19 = vector.load %arg4[%c0_12, %c0_13, %c0_14] : memref<1x2x16xf32, #tpu.memory_space<vmem>>, vector<1x2x16xf32>
    %20 = vector.shape_cast %19 : vector<1x2x16xf32> to vector<2x16xf32>
    %21 = vector.shape_cast %18 : vector<2x16xf32> to vector<1x2x16xf32>
    tpu.vector_store %arg4[%c0_12, %c0_13, %c0_14], %21 {strides = array<i32>} : memref<1x2x16xf32, #tpu.memory_space<vmem>>, vector<1x2x16xf32>,
    return
  }
  func.func @transform_0(%arg0: i32) -> (i32, i32, i32) {
    %c0_i32 = arith.constant 0 : i32
    %c0_i32_0 = arith.constant 0 : i32
    %c0_i32_1 = arith.constant 0 : i32
    return %arg0, %c0_i32, %c0_i32_0 : i32, i32, i32
  }
  func.func @transform_1(%arg0: i32) -> (i32, i32, i32) {
    %c0_i32 = arith.constant 0 : i32
    %c0_i32_0 = arith.constant 0 : i32
    %c0_i32_1 = arith.constant 0 : i32
    return %arg0, %c0_i32, %c0_i32_0 : i32, i32, i32
  }
  func.func @transform_2(%arg0: i32) -> (i32, i32, i32) {
    %c0_i32 = arith.constant 0 : i32
    %c0_i32_0 = arith.constant 0 : i32
    %c0_i32_1 = arith.constant 0 : i32
    return %arg0, %c0_i32, %c0_i32_0 : i32, i32, i32
  }
  func.func @transform_3(%arg0: i32) -> (i32, i32, i32) {
    %c0_i32 = arith.constant 0 : i32
    %c0_i32_0 = arith.constant 0 : i32
    %c0_i32_1 = arith.constant 0 : i32
    return %arg0, %c0_i32, %c0_i32_0 : i32, i32, i32
  }
}

module attributes {stable_mosaic.version = 11 : i64} {
  func.func @_layernorm_kernel(%arg0: i32, %arg1: memref<8x32xf32, #tpu.memory_space<vmem>>, %arg2: memref<1x32xf32, #tpu.memory_space<vmem>>, %arg3: memref<1x32xf32, #tpu.memory_space<vmem>>, %arg4: memref<8x32xf32, #tpu.memory_space<vmem>>) attributes {dimension_semantics = [#tpu.dimension_semantics<parallel>], iteration_bounds = array<i64: 1>, scalar_prefetch = 0 : i64, scratch_operands = 0 : i64, tpu.core_type = #tpu.core_type<tc>, window_params = [{transform_indices = @transform_0, window_bounds = array<i64: 8, 32>}, {pipeline_mode = #tpu.pipeline_mode<synchronous>, transform_indices = @transform_1, window_bounds = array<i64: 1, 32>}, {pipeline_mode = #tpu.pipeline_mode<synchronous>, transform_indices = @transform_2, window_bounds = array<i64: 1, 32>}, {transform_indices = @transform_3, window_bounds = array<i64: 8, 32>}]} {
    %c0 = arith.constant 0 : index
    %c0_0 = arith.constant 0 : index
    %0 = vector.load %arg1[%c0, %c0_0] : memref<8x32xf32, #tpu.memory_space<vmem>>, vector<8x32xf32>
    %cst = arith.constant dense<0.000000e+00> : vector<8xf32>
    %1 = vector.multi_reduction <add>, %0, %cst [1] : vector<8x32xf32> to vector<8xf32>
    %2 = vector.shape_cast %1 : vector<8xf32> to vector<8x1xf32>
    %cst_1 = arith.constant 3.200000e+01 : f32
    %3 = vector.broadcast %cst_1 : f32 to vector<8x1xf32>
    %4 = arith.divf %2, %3 : vector<8x1xf32>
    %5 = vector.broadcast %4 : vector<8x1xf32> to vector<8x32xf32>
    %6 = arith.subf %0, %5 : vector<8x32xf32>
    %7 = arith.mulf %6, %6 : vector<8x32xf32>
    %cst_2 = arith.constant dense<0.000000e+00> : vector<8xf32>
    %8 = vector.multi_reduction <add>, %7, %cst_2 [1] : vector<8x32xf32> to vector<8xf32>
    %9 = vector.shape_cast %8 : vector<8xf32> to vector<8x1xf32>
    %cst_3 = arith.constant 3.200000e+01 : f32
    %10 = vector.broadcast %cst_3 : f32 to vector<8x1xf32>
    %11 = arith.divf %9, %10 : vector<8x1xf32>
    %cst_4 = arith.constant 9.99999974E-6 : f32
    %12 = vector.broadcast %cst_4 : f32 to vector<8x1xf32>
    %13 = arith.addf %11, %12 : vector<8x1xf32>
    %14 = math.rsqrt %13 : vector<8x1xf32>
    %15 = vector.broadcast %14 : vector<8x1xf32> to vector<8x32xf32>
    %16 = arith.mulf %6, %15 : vector<8x32xf32>
    %c0_5 = arith.constant 0 : index
    %c0_6 = arith.constant 0 : index
    %17 = vector.load %arg2[%c0_5, %c0_6] : memref<1x32xf32, #tpu.memory_space<vmem>>, vector<1x32xf32>
    %18 = vector.broadcast %17 : vector<1x32xf32> to vector<8x32xf32>
    %19 = arith.mulf %16, %18 : vector<8x32xf32>
    %c0_7 = arith.constant 0 : index
    %c0_8 = arith.constant 0 : index
    %20 = vector.load %arg3[%c0_7, %c0_8] : memref<1x32xf32, #tpu.memory_space<vmem>>, vector<1x32xf32>
    %21 = vector.broadcast %20 : vector<1x32xf32> to vector<8x32xf32>
    %22 = arith.addf %19, %21 : vector<8x32xf32>
    %c0_9 = arith.constant 0 : index
    %c0_10 = arith.constant 0 : index
    %23 = vector.load %arg4[%c0_9, %c0_10] : memref<8x32xf32, #tpu.memory_space<vmem>>, vector<8x32xf32>
    tpu.vector_store %arg4[%c0_9, %c0_10], %22 {strides = array<i32>} : memref<8x32xf32, #tpu.memory_space<vmem>>, vector<8x32xf32>,
    return
  }
  func.func @transform_0(%arg0: i32) -> (i32, i32) {
    %c0_i32 = arith.constant 0 : i32
    %c0_i32_0 = arith.constant 0 : i32
    return %arg0, %c0_i32 : i32, i32
  }
  func.func @transform_1(%arg0: i32) -> (i32, i32) {
    %c0_i32 = arith.constant 0 : i32
    %c0_i32_0 = arith.constant 0 : i32
    %c0_i32_1 = arith.constant 0 : i32
    return %c0_i32, %c0_i32_0 : i32, i32
  }
  func.func @transform_2(%arg0: i32) -> (i32, i32) {
    %c0_i32 = arith.constant 0 : i32
    %c0_i32_0 = arith.constant 0 : i32
    %c0_i32_1 = arith.constant 0 : i32
    return %c0_i32, %c0_i32_0 : i32, i32
  }
  func.func @transform_3(%arg0: i32) -> (i32, i32) {
    %c0_i32 = arith.constant 0 : i32
    %c0_i32_0 = arith.constant 0 : i32
    return %arg0, %c0_i32 : i32, i32
  }
}

module attributes {stable_mosaic.version = 11 : i64} {
  func.func @_linear_kernel(%arg0: i32, %arg1: memref<8x128xf32, #tpu.memory_space<vmem>>, %arg2: memref<128x128xf32, #tpu.memory_space<vmem>>, %arg3: memref<1x128xf32, #tpu.memory_space<vmem>>, %arg4: memref<8x128xf32, #tpu.memory_space<vmem>>) attributes {dimension_semantics = [#tpu.dimension_semantics<parallel>], iteration_bounds = array<i64: 1>, scalar_prefetch = 0 : i64, scratch_operands = 0 : i64, tpu.core_type = #tpu.core_type<tc>, window_params = [{transform_indices = @transform_0, window_bounds = array<i64: 8, 128>}, {pipeline_mode = #tpu.pipeline_mode<synchronous>, transform_indices = @transform_1, window_bounds = array<i64: 128, 128>}, {pipeline_mode = #tpu.pipeline_mode<synchronous>, transform_indices = @transform_2, window_bounds = array<i64: 1, 128>}, {transform_indices = @transform_3, window_bounds = array<i64: 8, 128>}]} {
    %c0 = arith.constant 0 : index
    %c0_0 = arith.constant 0 : index
    %0 = vector.load %arg1[%c0, %c0_0] : memref<8x128xf32, #tpu.memory_space<vmem>>, vector<8x128xf32>
    %c0_1 = arith.constant 0 : index
    %c0_2 = arith.constant 0 : index
    %1 = vector.load %arg2[%c0_1, %c0_2] : memref<128x128xf32, #tpu.memory_space<vmem>>, vector<128x128xf32>
    %cst = arith.constant dense<0.000000e+00> : vector<8x128xf32>
    %2 = tpu.matmul %0, %1, %cst {dimension_numbers = #tpu.dot_dimension_numbers<[1], [0], [0], [1], [0, 0, 1, 1], [], []>} : vector<8x128xf32>, vector<128x128xf32>, vector<8x128xf32> -> vector<8x128xf32>
    %c0_3 = arith.constant 0 : index
    %c0_4 = arith.constant 0 : index
    %3 = vector.load %arg3[%c0_3, %c0_4] : memref<1x128xf32, #tpu.memory_space<vmem>>, vector<1x128xf32>
    %4 = vector.broadcast %3 : vector<1x128xf32> to vector<8x128xf32>
    %5 = arith.addf %2, %4 : vector<8x128xf32>
    %c0_5 = arith.constant 0 : index
    %c0_6 = arith.constant 0 : index
    %6 = vector.load %arg4[%c0_5, %c0_6] : memref<8x128xf32, #tpu.memory_space<vmem>>, vector<8x128xf32>
    tpu.vector_store %arg4[%c0_5, %c0_6], %5 {strides = array<i32>} : memref<8x128xf32, #tpu.memory_space<vmem>>, vector<8x128xf32>,
    return
  }
  func.func @transform_0(%arg0: i32) -> (i32, i32) {
    %c0_i32 = arith.constant 0 : i32
    %c0_i32_0 = arith.constant 0 : i32
    return %arg0, %c0_i32 : i32, i32
  }
  func.func @transform_1(%arg0: i32) -> (i32, i32) {
    %c0_i32 = arith.constant 0 : i32
    %c0_i32_0 = arith.constant 0 : i32
    %c0_i32_1 = arith.constant 0 : i32
    return %c0_i32, %c0_i32_0 : i32, i32
  }
  func.func @transform_2(%arg0: i32) -> (i32, i32) {
    %c0_i32 = arith.constant 0 : i32
    %c0_i32_0 = arith.constant 0 : i32
    %c0_i32_1 = arith.constant 0 : i32
    return %c0_i32, %c0_i32_0 : i32, i32
  }
  func.func @transform_3(%arg0: i32) -> (i32, i32) {
    %c0_i32 = arith.constant 0 : i32
    %c0_i32_0 = arith.constant 0 : i32
    return %arg0, %c0_i32 : i32, i32
  }
}

</mosaic_0001>

<bundles_post_ra>
// kernel: _lambda_.17
= control target key start
LH: loop header
LB: loop body
LE: loop exit
PB: predicated region body
PF: predicated region fallthrough
CT: control target
= control target key end

     0   :  { %vm16_vm0 = vcmask 261120   ;;  %s118_s0 = inlined_call_operand.vmem [shape: f32[16,32], index: 0, kind: input, shape index: {}]   ;;  %s119_s1 = inlined_call_operand.vmem [shape: f32[1,32], index: 1, kind: input, shape index: {}]   ;;  %s120_s2 = inlined_call_operand.vmem [shape: f32[1,32], index: 2, kind: input, shape index: {}]   ;;  %s121_s3 = inlined_call_operand.vmem [shape: f32[16,32], index: 3, kind: output, shape index: {}]  }
   0x1   :  { %v14_v0 = vld [vmem:[%s118_s0] sm:$0xff]  ;;  %v15_v1 = vld [vmem:[%s118_s0 + $0x8] sm:$0xff] }
   0x2   :  { %v17_v2 = vsel %vm16_vm0, %v14_v0, 0.0  ;;  %v20_v3 = vsel %vm16_vm0, %v15_v1, 0.0  ;;  %v68_v21 = vld [vmem:[%s119_s1] ss:$0 sm:$0xff] }
   0x3   :  { %18 = vadd.xlane.f32.xlu0 %v17_v2  ;;  %v69_v23 = vld [vmem:[%s120_s2] ss:$0 sm:$0xff] }
   0x7   :  { %21 = vadd.xlane.f32.xlu0 %v20_v3 }
  0x90   :  { %v19_v4 = vpop.xlane.xlu0 %18 }
  0x91   :  { %v24_v5 = vmul.f32 0.03125, %v19_v4 }
  0x93   :  { %v26_v6 = vsub.f32 %v14_v0, %v24_v5 }
  0x94   :  { %v22_v7 = vpop.xlane.xlu0 %21 }
  0x95   :  { %v25_v8 = vmul.f32 0.03125, %v22_v7  ;;  %v28_v9 = vmul.f32 %v26_v6, %v26_v6 }
  0x97   :  { %v27_v10 = vsub.f32 %v15_v1, %v25_v8  ;;  %v30_v11 = vsel %vm16_vm0, %v28_v9, 0.0 }
  0x98   :  { %31 = vadd.xlane.f32.xlu1 %v30_v11 }
  0x99   :  { %v29_v12 = vmul.f32 %v27_v10, %v27_v10 }
  0x9b   :  { %v33_v13 = vsel %vm16_vm0, %v29_v12, 0.0 }
  0x9c   :  { %34 = vadd.xlane.f32.xlu1 %v33_v13 }
 0x125   :  { %v32_v14 = vpop.xlane.xlu1 %31 }
 0x126   :  { %v36_v15 = vmul.f32 0.03125, %v32_v14 }
 0x128   :  { %v38_v16 = vadd.f32 1e-05, %v36_v15 }
 0x129   :  { %v35_v17 = vpop.xlane.xlu1 %34 }
 0x12a   :  { %70 = vrsqrt.f32 %v38_v16  ;;  %v37_v18 = vmul.f32 0.03125, %v35_v17 }
 0x12c   :  { %v39_v19 = vadd.f32 1e-05, %v37_v18 }
 0x12e   :  { %72 = vrsqrt.f32 %v39_v19 }
 0x134   :  { %v71_v20 = vpop.eup %70 }
 0x135   :  { %v42_v22 = vmul.f32 %v71_v20, %v26_v6 }
 0x137   :  { %v51_v24 = vmul.f32 %v68_v21, %v42_v22 }
 0x138   :  { %v73_v25 = vpop.eup %72 }
 0x139   :  { %v60_v26 = vadd.f32 %v69_v23, %v51_v24  ;;  %v43_v27 = vmul.f32 %v73_v25, %v27_v10 }
 0x13b   :  { %62 = vst.msk [vmem:[%s121_s3] sm:$0xff] %vm16_vm0, %v60_v26  ;;  %v52_v28 = vmul.f32 %v68_v21, %v43_v27 }
 0x13d   :  { %v61_v29 = vadd.f32 %v69_v23, %v52_v28 }
 0x13f   :  { %63 = vst.msk [vmem:[%s121_s3 + $0x8] sm:$0xff] %vm16_vm0, %v61_v29 }

// kernel: _lambda_.18
= control target key start
LH: loop header
LB: loop body
LE: loop exit
PB: predicated region body
PF: predicated region fallthrough
CT: control target
= control target key end

     0   :  { %s289_s1 = inlined_call_operand.vmem [shape: f32[128,128], index: 1, kind: input, shape index: {}]   ;;  %s290_s0 = inlined_call_operand.vmem [shape: f32[16,128], index: 0, kind: input, shape index: {}]   ;;  %s291_s2 = inlined_call_operand.vmem [shape: f32[1,128], index: 2, kind: input, shape index: {}]   ;;  %s292_s3 = inlined_call_operand.vmem [shape: f32[16,128], index: 3, kind: output, shape index: {}]  }
   0x1   :  { %v16_v0 = vld [vmem:[%s289_s1] sm:$0xff]  ;;  %v17_v1 = vld [vmem:[%s289_s1 + $0x8] sm:$0xff]  ;;  %v18_v2 = vld [vmem:[%s289_s1 + $0x10] sm:$0xff] }
   0x2   :  { %v174_v3 = vpack.c.bf16 %v17_v1, %v16_v0  ;;  %v19_v4 = vld [vmem:[%s289_s1 + $0x18] sm:$0xff]  ;;  %v20_v6 = vld [vmem:[%s289_s1 + $0x20] sm:$0xff]  ;;  %v21_v7 = vld [vmem:[%s289_s1 + $0x28] sm:$0xff] }
   0x3   :  { %v178_v5 = vpack.c.bf16 %v19_v4, %v18_v2  ;;  %v182_v8 = vpack.c.bf16 %v21_v7, %v20_v6  ;;  %v14_v9 = vld [vmem:[%s290_s0] sm:$0xff]  ;;  %v22_v10 = vld [vmem:[%s289_s1 + $0x30] sm:$0xff]  ;;  %v23_v11 = vld [vmem:[%s289_s1 + $0x38] sm:$0xff] }
   0x4   :  { %175 = vmatprep.subr.bf16.mxu0 %v174_v3  ;;  %171 = vmatprep.mubr.f32.mxu0 %v14_v9  ;;  %v186_v12 = vpack.c.bf16 %v23_v11, %v22_v10  ;;  %v24_v13 = vld [vmem:[%s289_s1 + $0x40] sm:$0xff]  ;;  %v25_v14 = vld [vmem:[%s289_s1 + $0x48] sm:$0xff]  ;;  %v26_v16 = vld [vmem:[%s289_s1 + $0x50] sm:$0xff] }
   0x5   :  { %177 = vmatpush3.bf16.msra.mxu0 %v174_v3  ;;  %v190_v15 = vpack.c.bf16 %v25_v14, %v24_v13  ;;  %v27_v17 = vld [vmem:[%s289_s1 + $0x58] sm:$0xff]  ;;  %v28_v19 = vld [vmem:[%s289_s1 + $0x60] sm:$0xff]  ;;  %v29_v20 = vld [vmem:[%s289_s1 + $0x68] sm:$0xff] }
   0x6   :  { %179 = vmatprep.subr.bf16.mxu0 %v178_v5  ;;  %v194_v18 = vpack.c.bf16 %v27_v17, %v26_v16  ;;  %v198_v21 = vpack.c.bf16 %v29_v20, %v28_v19  ;;  %v30_v22 = vld [vmem:[%s289_s1 + $0x70] sm:$0xff]  ;;  %v31_v23 = vld [vmem:[%s289_s1 + $0x78] sm:$0xff]  ;;  %v15_v25 = vld [vmem:[%s290_s0 + $0x8] sm:$0xff] }
   0x7   :  { %v202_v24 = vpack.c.bf16 %v31_v23, %v30_v22  ;;  %v120_v26 = vld [vmem:[%s291_s2] ss:$0 sm:$0xff] }
   0x9   :  { %181 = vmatpush3.bf16.msra.mxu0 %v178_v5 }
   0xa   :  { %183 = vmatprep.subr.bf16.mxu0 %v182_v8 }
   0xd   :  { %185 = vmatpush3.bf16.msra.mxu0 %v182_v8 }
   0xe   :  { %187 = vmatprep.subr.bf16.mxu0 %v186_v12 }
  0x11   :  { %189 = vmatpush3.bf16.msra.mxu0 %v186_v12 }
  0x12   :  { %191 = vmatprep.subr.bf16.mxu0 %v190_v15 }
  0x15   :  { %193 = vmatpush3.bf16.msra.mxu0 %v190_v15 }
  0x16   :  { %195 = vmatprep.subr.bf16.mxu0 %v194_v18 }
  0x19   :  { %197 = vmatpush3.bf16.msra.mxu0 %v194_v18 }
  0x1a   :  { %199 = vmatprep.subr.bf16.mxu0 %v198_v21 }
  0x1d   :  { %201 = vmatpush3.bf16.msra.mxu0 %v198_v21 }
  0x1e   :  { %203 = vmatprep.subr.bf16.mxu0 %v202_v24 }
  0x21   :  { %205 = vmatpush3.bf16.msra.mxu0 %v202_v24 }
  0x24   :  { %172 = vmatmul.mubr.f32.vlgmr.msra.gmra.mrb[0].mxu0 %v15_v25 }
  0xf7   :  { %v173_v27 = vpop.f32.mrb[0].mxu0 }
  0xf8   :  { %v111_v28 = vadd.f32 %v173_v27, %v120_v26  ;;  %v105_v29 = vpop.f32.mrb[1].mxu0 }
  0xf9   :  { %v106_v30 = vadd.f32 %v120_v26, %v105_v29 }
  0xfa   :  { %115 = vst [vmem:[%s292_s3 + $0x8] sm:$0xff] %v111_v28 }
  0xfb   :  { %114 = vst [vmem:[%s292_s3] sm:$0xff] %v106_v30 }

// kernel: _lambda_.22
= control target key start
LH: loop header
LB: loop body
LE: loop exit
PB: predicated region body
PF: predicated region fallthrough
CT: control target
= control target key end

     0   :  { %s523_s12 = smov 0   ;;  %s552_s0 = inlined_call_operand.vmem [shape: f32[8,4,16], index: 0, kind: input, shape index: {}]   ;;  %s553_s1 = inlined_call_operand.vmem [shape: f32[8,4,16], index: 1, kind: input, shape index: {}]   ;;  %s554_s2 = inlined_call_operand.vmem [shape: f32[8,4,16], index: 2, kind: input, shape index: {}]   ;;  %s555_s3 = inlined_call_operand.vmem [shape: f32[8,4,16], index: 3, kind: output, shape index: {}]  }
   0x1 LB: > { %s450_s13 = sadd.s32 4294967295, %s499_s12   ;;  %p454_p0 = scmp.ge.s32.totalorder %s499_s12, 1  ;;  %s499_s12 = sphi %s523_s12, %s13_s12  }
   0x2   : > { %p154_p1 = scmp.lt.s32.totalorder %s499_s12, 9 }
   0x4   : > { %p155_p2 = pnand %p454_p0, %p154_p1 }
   0x5   : > { %p184_p3 = scmp.lt.s32.totalorder (!%p155_p2), %s450_s13, 7  ;;  %v501_v0 = vmov (!%p155_p2), 0.0   ;;  %vm502_vm0 = vmmov (!%p155_p2), 0   ;;  %vm203_vm1 = vcmask (!%p155_p2), 130048   ;;  %vm281_vm2 = vcmask (!%p155_p2), 27648  }
   0x6   : > { %158 = sbr.rel (%p155_p2) target bundleno = 761 (0x2f9), region = 32  ;;  %469 = vmatprep.subr.mxu0 (!%p155_p2), %v501_v0  ;;  %471 = vmatprep.mubr.msk.f32.mxu0 (!%p155_p2), %vm502_vm0, %v501_v0  ;;  %vm297_vm3 = vcmask (!%p155_p2), 1043456   ;;  %vm293_vm4 = vcmask (!%p155_p2), 31744   ;;  %vm371_vm5 = vcmask (!%p155_p2), 125952  }
   0x7   : > { %474 = vmatprep.subr.mxu1 (!%p155_p2), %v501_v0  ;;  %476 = vmatprep.mubr.msk.f32.mxu1 (!%p155_p2), %vm502_vm0, %v501_v0 }
   0xd   : > { %s557_s13 = smov (!%p184_p3, %s450_s13), 7 }
   0xe   : > { %s531_s14 = sshll.u32 %s557_s13, 2 }
   0xf   : > { %s191_s17 = scalar_lea.vmem %s553_s1, %s531_s14  ;;  %s187_s20 = scalar_lea.vmem %s552_s0, %s531_s14 }
  0x10   : > { %v201_v1 = vld [vmem:[%s191_s17] sm:$0xf]  ;;  %s195_s23 = scalar_lea.vmem %s554_s2, %s531_s14  ;;  %s199_s26 = scalar_lea.vmem %s555_s3, %s531_s14 }
  0x11   : > { %470 = vmatpush3.xpose.msk.msra.mxu0 %vm203_vm1, %v201_v1  ;;  %v200_v2 = vld [vmem:[%s187_s20] sm:$0xf] }
  0x12   : > { %v202_v12 = vld [vmem:[%s195_s23] sm:$0xf] }
  0x13   : > { %475 = vmatpush3.msk.msra.mxu1 %vm297_vm3, %v202_v12 }
  0x14   : > { %472 = vmatmul.mubr.msk.f32.vlgmr.msra.gmra.mrb[0].mxu0 %vm203_vm1, %v200_v2 }
  0xe7   : > { %v276_v3 = vpop.f32.mrb[0].mxu0 }
  0xe8   : > { %v280_v4 = vmul.f32 0.25, %v276_v3  ;;  %v473_v5 = vpop.f32.mrb[1].mxu0 }
  0xea   : > { %v282_v6 = vsel %vm281_vm2, %v280_v4, -inf }
  0xeb   : > { %283 = vmax.xlane.f32.xlu0 %v282_v6 }
 0x178   : > { %v284_v7 = vpop.xlane.xlu0 %283 }
 0x179   : > { %v285_v8 = vsub.f32 %v280_v4, %v284_v7 }
 0x17b   : > { %v286_v9 = vmul.f32 1.442695, %v285_v8 }
 0x17d   : > { %489 = vpow2.f32 %v286_v9 }
 0x187   : > { %v490_v10 = vpop.eup %489 }
 0x188   : > { %v288_v11 = vsel %vm281_vm2, %v490_v10, 0.0 }
 0x189   : > { %289 = vadd.xlane.f32.xlu0 %v288_v11 }
 0x216   : > { %v290_v13 = vpop.xlane.xlu0 %289 }
 0x217   : > { %491 = vrcp.f32 %v290_v13 }
 0x221   : > { %v492_v14 = vpop.eup %491 }
 0x222   : > { %v292_v15 = vmul.f32 %v492_v14, %v490_v10 }
 0x224   : > { %477 = vmatmul.mubr.msk.f32.vlgmr.msra.gmra.mrb[0].mxu1 %vm293_vm4, %v292_v15 }
 0x2f7   : > { %v367_v16 = vpop.f32.mrb[0].mxu1 }
 0x2f8   : > { %372 = vst.msk [vmem:[%s199_s26] sm:$0xf] %vm371_vm5, %v367_v16  ;;  %v478_v17 = vpop.f32.mrb[1].mxu1 }
 0x2f9 PF: > { %s13_s12 = sadd.s32 1, %s499_s12  }
 0x2fa   : > { %p10_p4 = scmp.ge.s32.totalorder %s13_s12, 10  }
 0x2fc   :  { %12 = sbr.rel (!%p10_p4) target bundleno = 1 (0x1), region = 68 }

// kernel: _lambda_.25
= control target key start
LH: loop header
LB: loop body
LE: loop exit
PB: predicated region body
PF: predicated region fallthrough
CT: control target
= control target key end

     0   :  { %s573_s1 = inlined_call_operand.vmem [shape: f32[128,128], index: 1, kind: input, shape index: {}]   ;;  %s574_s0 = inlined_call_operand.vmem [shape: f32[16,128], index: 0, kind: input, shape index: {}]   ;;  %s575_s3 = inlined_call_operand.vmem [shape: f32[128,128], index: 3, kind: input, shape index: {}]   ;;  %s576_s2 = inlined_call_operand.vmem [shape: f32[1,128], index: 2, kind: input, shape index: {}]   ;;  %s577_s4 = inlined_call_operand.vmem [shape: f32[1,128], index: 4, kind: input, shape index: {}]   ;;  %s578_s5 = inlined_call_operand.vmem [shape: f32[16,128], index: 5, kind: output, shape index: {}]  }
   0x1   :  { %v28_v0 = vld [vmem:[%s573_s1] sm:$0xff]  ;;  %v29_v1 = vld [vmem:[%s573_s1 + $0x8] sm:$0xff]  ;;  %v30_v2 = vld [vmem:[%s573_s1 + $0x10] sm:$0xff] }
   0x2   :  { %v361_v3 = vpack.c.bf16 %v29_v1, %v28_v0  ;;  %v31_v4 = vld [vmem:[%s573_s1 + $0x18] sm:$0xff]  ;;  %v32_v6 = vld [vmem:[%s573_s1 + $0x20] sm:$0xff]  ;;  %v33_v7 = vld [vmem:[%s573_s1 + $0x28] sm:$0xff] }
   0x3   :  { %v365_v5 = vpack.c.bf16 %v31_v4, %v30_v2  ;;  %v369_v8 = vpack.c.bf16 %v33_v7, %v32_v6  ;;  %v34_v9 = vld [vmem:[%s573_s1 + $0x30] sm:$0xff]  ;;  %v35_v10 = vld [vmem:[%s573_s1 + $0x38] sm:$0xff]  ;;  %v26_v11 = vld [vmem:[%s574_s0] sm:$0xff] }
   0x4   :  { %362 = vmatprep.subr.bf16.mxu0 %v361_v3  ;;  %323 = vmatprep.mubr.f32.mxu0 %v26_v11  ;;  %v138_v12 = vld [vmem:[%s575_s3] sm:$0xff]  ;;  %v139_v13 = vld [vmem:[%s575_s3 + $0x8] sm:$0xff]  ;;  %v140_v14 = vld [vmem:[%s575_s3 + $0x10] sm:$0xff]  ;;  %v373_v20 = vpack.c.bf16 %v35_v10, %v34_v9 }
   0x5   :  { %364 = vmatpush3.bf16.msra.mxu0 %v361_v3  ;;  %v393_v15 = vpack.c.bf16 %v139_v13, %v138_v12  ;;  %v141_v16 = vld [vmem:[%s575_s3 + $0x18] sm:$0xff]  ;;  %v142_v18 = vld [vmem:[%s575_s3 + $0x20] sm:$0xff]  ;;  %v143_v19 = vld [vmem:[%s575_s3 + $0x28] sm:$0xff] }
   0x6   :  { %366 = vmatprep.subr.bf16.mxu0 %v365_v5  ;;  %v397_v17 = vpack.c.bf16 %v141_v16, %v140_v14  ;;  %v36_v21 = vld [vmem:[%s573_s1 + $0x40] sm:$0xff]  ;;  %v37_v22 = vld [vmem:[%s573_s1 + $0x48] sm:$0xff]  ;;  %v401_v23 = vpack.c.bf16 %v143_v19, %v142_v18  ;;  %v38_v25 = vld [vmem:[%s573_s1 + $0x50] sm:$0xff] }
   0x7   :  { %394 = vmatprep.subr.bf16.mxu1 %v393_v15  ;;  %v377_v24 = vpack.c.bf16 %v37_v22, %v36_v21  ;;  %v39_v26 = vld [vmem:[%s573_s1 + $0x58] sm:$0xff]  ;;  %v40_v28 = vld [vmem:[%s573_s1 + $0x60] sm:$0xff]  ;;  %v41_v29 = vld [vmem:[%s573_s1 + $0x68] sm:$0xff] }
   0x8   :  { %396 = vmatpush3.bf16.msra.mxu1 %v393_v15  ;;  %v381_v27 = vpack.c.bf16 %v39_v26, %v38_v25  ;;  %v385_v30 = vpack.c.bf16 %v41_v29, %v40_v28  ;;  %v42_v31 = vld [vmem:[%s573_s1 + $0x70] sm:$0xff]  ;;  %v43_v32 = vld [vmem:[%s573_s1 + $0x78] sm:$0xff]  ;;  %v27_v34 = vld [vmem:[%s574_s0 + $0x8] sm:$0xff] }
   0x9   :  { %368 = vmatpush3.bf16.msra.mxu0 %v365_v5  ;;  %398 = vmatprep.subr.bf16.mxu1 %v397_v17  ;;  %v389_v33 = vpack.c.bf16 %v43_v32, %v42_v31  ;;  %v144_v35 = vld [vmem:[%s575_s3 + $0x30] sm:$0xff]  ;;  %v145_v36 = vld [vmem:[%s575_s3 + $0x38] sm:$0xff]  ;;  %v146_v38 = vld [vmem:[%s575_s3 + $0x40] sm:$0xff] }
   0xa   :  { %370 = vmatprep.subr.bf16.mxu0 %v369_v8  ;;  %v405_v37 = vpack.c.bf16 %v145_v36, %v144_v35  ;;  %v147_v39 = vld [vmem:[%s575_s3 + $0x48] sm:$0xff]  ;;  %v148_v41 = vld [vmem:[%s575_s3 + $0x50] sm:$0xff]  ;;  %v149_v42 = vld [vmem:[%s575_s3 + $0x58] sm:$0xff] }
   0xb   :  { %v409_v40 = vpack.c.bf16 %v147_v39, %v146_v38  ;;  %v413_v43 = vpack.c.bf16 %v149_v42, %v148_v41  ;;  %v150_v44 = vld [vmem:[%s575_s3 + $0x60] sm:$0xff]  ;;  %v151_v45 = vld [vmem:[%s575_s3 + $0x68] sm:$0xff]  ;;  %v152_v47 = vld [vmem:[%s575_s3 + $0x70] sm:$0xff] }
   0xc   :  { %400 = vmatpush3.bf16.msra.mxu1 %v397_v17  ;;  %v417_v46 = vpack.c.bf16 %v151_v45, %v150_v44  ;;  %v153_v48 = vld [vmem:[%s575_s3 + $0x78] sm:$0xff]  ;;  %v253_v50 = vld [vmem:[%s576_s2] ss:$0 sm:$0xff] }
   0xd   :  { %372 = vmatpush3.bf16.msra.mxu0 %v369_v8  ;;  %402 = vmatprep.subr.bf16.mxu1 %v401_v23  ;;  %v421_v49 = vpack.c.bf16 %v153_v48, %v152_v47  ;;  %v254_v1 = vld [vmem:[%s577_s4] ss:$0 sm:$0xff] }
   0xe   :  { %374 = vmatprep.subr.bf16.mxu0 %v373_v20 }
  0x10   :  { %404 = vmatpush3.bf16.msra.mxu1 %v401_v23 }
  0x11   :  { %376 = vmatpush3.bf16.msra.mxu0 %v373_v20  ;;  %406 = vmatprep.subr.bf16.mxu1 %v405_v37 }
  0x12   :  { %378 = vmatprep.subr.bf16.mxu0 %v377_v24 }
  0x14   :  { %408 = vmatpush3.bf16.msra.mxu1 %v405_v37 }
  0x15   :  { %380 = vmatpush3.bf16.msra.mxu0 %v377_v24  ;;  %410 = vmatprep.subr.bf16.mxu1 %v409_v40 }
  0x16   :  { %382 = vmatprep.subr.bf16.mxu0 %v381_v27 }
  0x18   :  { %412 = vmatpush3.bf16.msra.mxu1 %v409_v40 }
  0x19   :  { %384 = vmatpush3.bf16.msra.mxu0 %v381_v27  ;;  %414 = vmatprep.subr.bf16.mxu1 %v413_v43 }
  0x1a   :  { %386 = vmatprep.subr.bf16.mxu0 %v385_v30 }
  0x1c   :  { %416 = vmatpush3.bf16.msra.mxu1 %v413_v43 }
  0x1d   :  { %388 = vmatpush3.bf16.msra.mxu0 %v385_v30  ;;  %418 = vmatprep.subr.bf16.mxu1 %v417_v46 }
  0x1e   :  { %390 = vmatprep.subr.bf16.mxu0 %v389_v33 }
  0x20   :  { %420 = vmatpush3.bf16.msra.mxu1 %v417_v46 }
  0x21   :  { %392 = vmatpush3.bf16.msra.mxu0 %v389_v33  ;;  %422 = vmatprep.subr.bf16.mxu1 %v421_v49 }
  0x24   :  { %324 = vmatmul.mubr.f32.vlgmr.msra.gmra.mrb[0].mxu0 %v27_v34  ;;  %424 = vmatpush3.bf16.msra.mxu1 %v421_v49 }
  0xf7   :  { %v325_v51 = vpop.f32.mrb[0].mxu0 }
  0xf8   :  { %v123_v52 = vadd.f32 %v325_v51, %v253_v50  ;;  %v117_v53 = vpop.f32.mrb[1].mxu0 }
  0xf9   :  { %v118_v54 = vadd.f32 %v253_v50, %v117_v53 }
  0xfa   :  { %v129_v55 = vmul.f32 0.70710677, %v123_v52  ;;  %v127_v62 = vmul.f32 0.5, %v123_v52 }
  0xfb   :  { %v128_v56 = vmul.f32 0.70710677, %v118_v54  ;;  %v126_v60 = vmul.f32 0.5, %v118_v54 }
  0xfc   :  { %425 = verf.f32 %v129_v55 }
  0xfd   :  { %427 = verf.f32 %v128_v56 }
 0x106   :  { %v426_v57 = vpop.eup %425 }
 0x107   :  { %v428_v58 = vpop.eup %427  ;;  %v133_v59 = vadd.f32 1.0, %v426_v57 }
 0x108   :  { %v132_v61 = vadd.f32 1.0, %v428_v58 }
 0x109   :  { %v135_v0 = vmul.f32 %v133_v59, %v127_v62 }
 0x10a   :  { %v134_v63 = vmul.f32 %v132_v61, %v126_v60 }
 0x10c   :  { %358 = vmatprep.mubr.f32.mxu1 %v134_v63 }
 0x10d   :  { %359 = vmatmul.mubr.f32.vlgmr.msra.gmra.mrb[0].mxu1 %v135_v0 }
 0x1e0   :  { %v360_v2 = vpop.f32.mrb[0].mxu1 }
 0x1e1   :  { %v246_v3 = vadd.f32 %v360_v2, %v254_v1  ;;  %v220_v4 = vpop.f32.mrb[1].mxu1 }
 0x1e2   :  { %v245_v5 = vadd.f32 %v254_v1, %v220_v4 }
 0x1e3   :  { %248 = vst [vmem:[%s578_s5 + $0x8] sm:$0xff] %v246_v3 }
 0x1e4   :  { %247 = vst [vmem:[%s578_s5] sm:$0xff] %v245_v5 }

// kernel: _lambda_.28
= control target key start
LH: loop header
LB: loop body
LE: loop exit
PB: predicated region body
PF: predicated region fallthrough
CT: control target
= control target key end

     0   :  { %s523_s12 = smov 0   ;;  %s552_s0 = inlined_call_operand.vmem [shape: f32[16,2,16], index: 0, kind: input, shape index: {}]   ;;  %s553_s1 = inlined_call_operand.vmem [shape: f32[16,2,16], index: 1, kind: input, shape index: {}]   ;;  %s554_s2 = inlined_call_operand.vmem [shape: f32[16,2,16], index: 2, kind: input, shape index: {}]   ;;  %s555_s3 = inlined_call_operand.vmem [shape: f32[16,2,16], index: 3, kind: output, shape index: {}]  }
   0x1 LB: > { %s450_s13 = sadd.s32 4294967295, %s499_s12   ;;  %p454_p0 = scmp.ge.s32.totalorder %s499_s12, 1  ;;  %s499_s12 = sphi %s523_s12, %s13_s12  }
   0x2   : > { %p154_p1 = scmp.lt.s32.totalorder %s499_s12, 17 }
   0x4   : > { %p155_p2 = pnand %p454_p0, %p154_p1 }
   0x5   : > { %p184_p3 = scmp.lt.s32.totalorder (!%p155_p2), %s450_s13, 15  ;;  %v501_v0 = vmov (!%p155_p2), 0.0   ;;  %vm502_vm0 = vmmov (!%p155_p2), 0   ;;  %vm203_vm1 = vcmask (!%p155_p2), 130048   ;;  %vm281_vm2 = vcmask (!%p155_p2), 9216  }
   0x6   : > { %158 = sbr.rel (%p155_p2) target bundleno = 761 (0x2f9), region = 32  ;;  %469 = vmatprep.subr.mxu0 (!%p155_p2), %v501_v0  ;;  %471 = vmatprep.mubr.msk.f32.mxu0 (!%p155_p2), %vm502_vm0, %v501_v0  ;;  %vm297_vm3 = vcmask (!%p155_p2), 1041408   ;;  %vm293_vm4 = vcmask (!%p155_p2), 15360   ;;  %vm371_vm5 = vcmask (!%p155_p2), 123904  }
   0x7   : > { %474 = vmatprep.subr.mxu1 (!%p155_p2), %v501_v0  ;;  %476 = vmatprep.mubr.msk.f32.mxu1 (!%p155_p2), %vm502_vm0, %v501_v0 }
   0xd   : > { %s557_s13 = smov (!%p184_p3, %s450_s13), 15 }
   0xe   : > { %s531_s14 = sshll.u32 %s557_s13, 1 }
   0xf   : > { %s191_s17 = scalar_lea.vmem %s553_s1, %s531_s14  ;;  %s187_s20 = scalar_lea.vmem %s552_s0, %s531_s14 }
  0x10   : > { %v201_v1 = vld [vmem:[%s191_s17] sm:$0x3]  ;;  %s195_s23 = scalar_lea.vmem %s554_s2, %s531_s14  ;;  %s199_s26 = scalar_lea.vmem %s555_s3, %s531_s14 }
  0x11   : > { %470 = vmatpush3.xpose.msk.msra.mxu0 %vm203_vm1, %v201_v1  ;;  %v200_v2 = vld [vmem:[%s187_s20] sm:$0x3] }
  0x12   : > { %v202_v12 = vld [vmem:[%s195_s23] sm:$0x3] }
  0x13   : > { %475 = vmatpush3.msk.msra.mxu1 %vm297_vm3, %v202_v12 }
  0x14   : > { %472 = vmatmul.mubr.msk.f32.vlgmr.msra.gmra.mrb[0].mxu0 %vm203_vm1, %v200_v2 }
  0xe7   : > { %v276_v3 = vpop.f32.mrb[0].mxu0 }
  0xe8   : > { %v280_v4 = vmul.f32 0.25, %v276_v3  ;;  %v473_v5 = vpop.f32.mrb[1].mxu0 }
  0xea   : > { %v282_v6 = vsel %vm281_vm2, %v280_v4, -inf }
  0xeb   : > { %283 = vmax.xlane.f32.xlu0 %v282_v6 }
 0x178   : > { %v284_v7 = vpop.xlane.xlu0 %283 }
 0x179   : > { %v285_v8 = vsub.f32 %v280_v4, %v284_v7 }
 0x17b   : > { %v286_v9 = vmul.f32 1.442695, %v285_v8 }
 0x17d   : > { %489 = vpow2.f32 %v286_v9 }
 0x187   : > { %v490_v10 = vpop.eup %489 }
 0x188   : > { %v288_v11 = vsel %vm281_vm2, %v490_v10, 0.0 }
 0x189   : > { %289 = vadd.xlane.f32.xlu0 %v288_v11 }
 0x216   : > { %v290_v13 = vpop.xlane.xlu0 %289 }
 0x217   : > { %491 = vrcp.f32 %v290_v13 }
 0x221   : > { %v492_v14 = vpop.eup %491 }
 0x222   : > { %v292_v15 = vmul.f32 %v492_v14, %v490_v10 }
 0x224   : > { %477 = vmatmul.mubr.msk.f32.vlgmr.msra.gmra.mrb[0].mxu1 %vm293_vm4, %v292_v15 }
 0x2f7   : > { %v367_v16 = vpop.f32.mrb[0].mxu1 }
 0x2f8   : > { %372 = vst.msk [vmem:[%s199_s26] sm:$0x3] %vm371_vm5, %v367_v16  ;;  %v478_v17 = vpop.f32.mrb[1].mxu1 }
 0x2f9 PF: > { %s13_s12 = sadd.s32 1, %s499_s12  }
 0x2fa   : > { %p10_p4 = scmp.ge.s32.totalorder %s13_s12, 18  }
 0x2fc   :  { %12 = sbr.rel (!%p10_p4) target bundleno = 1 (0x1), region = 68 }

// kernel: _lambda_.32
= control target key start
LH: loop header
LB: loop body
LE: loop exit
PB: predicated region body
PF: predicated region fallthrough
CT: control target
= control target key end

     0   :  { %vm15_vm0 = vcmask 261120   ;;  %s90_s0 = inlined_call_operand.vmem [shape: f32[8,32], index: 0, kind: input, shape index: {}]   ;;  %s91_s1 = inlined_call_operand.vmem [shape: f32[1,32], index: 1, kind: input, shape index: {}]   ;;  %s92_s2 = inlined_call_operand.vmem [shape: f32[1,32], index: 2, kind: input, shape index: {}]   ;;  %s93_s3 = inlined_call_operand.vmem [shape: f32[8,32], index: 3, kind: output, shape index: {}]  }
   0x1   :  { %v14_v0 = vld [vmem:[%s90_s0] sm:$0xff] }
   0x2   :  { %v16_v1 = vsel %vm15_vm0, %v14_v0, 0.0  ;;  %v51_v11 = vld [vmem:[%s91_s1] ss:$0 sm:$0xff] }
   0x3   :  { %17 = vadd.xlane.f32.xlu0 %v16_v1  ;;  %v52_v13 = vld [vmem:[%s92_s2] ss:$0 sm:$0xff] }
  0x90   :  { %v18_v2 = vpop.xlane.xlu0 %17 }
  0x91   :  { %v20_v3 = vmul.f32 0.03125, %v18_v2 }
  0x93   :  { %v21_v4 = vsub.f32 %v14_v0, %v20_v3 }
  0x95   :  { %v22_v5 = vmul.f32 %v21_v4, %v21_v4 }
  0x97   :  { %v23_v6 = vsel %vm15_vm0, %v22_v5, 0.0 }
  0x98   :  { %24 = vadd.xlane.f32.xlu0 %v23_v6 }
 0x125   :  { %v25_v7 = vpop.xlane.xlu0 %24 }
 0x126   :  { %v26_v8 = vmul.f32 0.03125, %v25_v7 }
 0x128   :  { %v27_v9 = vadd.f32 1e-05, %v26_v8 }
 0x12a   :  { %53 = vrsqrt.f32 %v27_v9 }
 0x134   :  { %v54_v10 = vpop.eup %53 }
 0x135   :  { %v29_v12 = vmul.f32 %v54_v10, %v21_v4 }
 0x137   :  { %v37_v14 = vmul.f32 %v51_v11, %v29_v12 }
 0x139   :  { %v45_v15 = vadd.f32 %v52_v13, %v37_v14 }
 0x13b   :  { %46 = vst.msk [vmem:[%s93_s3] sm:$0xff] %vm15_vm0, %v45_v15 }

// kernel: _lambda_.33
= control target key start
LH: loop header
LB: loop body
LE: loop exit
PB: predicated region body
PF: predicated region fallthrough
CT: control target
= control target key end

     0   :  { %v193_v0 = vmov 0.0|0.0   ;;  %vm194_vm0 = vmmov 0   ;;  %v195_v4 = vmov 0.0   ;;  %s273_s1 = inlined_call_operand.vmem [shape: f32[128,128], index: 1, kind: input, shape index: {}]   ;;  %s274_s0 = inlined_call_operand.vmem [shape: f32[8,128], index: 0, kind: input, shape index: {}]   ;;  %s275_s2 = inlined_call_operand.vmem [shape: f32[1,128], index: 2, kind: input, shape index: {}]   ;;  %s276_s3 = inlined_call_operand.vmem [shape: f32[8,128], index: 3, kind: output, shape index: {}]  }
   0x1   :  { %166 = vmatprep.subr.bf16.mxu0 %v193_v0  ;;  %v15_v1 = vld [vmem:[%s273_s1] sm:$0xff]  ;;  %v16_v2 = vld [vmem:[%s273_s1 + $0x8] sm:$0xff]  ;;  %v17_v3 = vld [vmem:[%s273_s1 + $0x10] sm:$0xff]  ;;  %163 = vmatprep.mubr.msk.f32.mxu0 %vm194_vm0, %v195_v4 }
   0x2   :  { %v167_v5 = vpack.c.bf16 %v16_v2, %v15_v1  ;;  %v18_v6 = vld [vmem:[%s273_s1 + $0x18] sm:$0xff]  ;;  %v19_v8 = vld [vmem:[%s273_s1 + $0x20] sm:$0xff]  ;;  %v20_v9 = vld [vmem:[%s273_s1 + $0x28] sm:$0xff] }
   0x3   :  { %v170_v7 = vpack.c.bf16 %v18_v6, %v17_v3  ;;  %v173_v10 = vpack.c.bf16 %v20_v9, %v19_v8  ;;  %v21_v11 = vld [vmem:[%s273_s1 + $0x30] sm:$0xff]  ;;  %v22_v12 = vld [vmem:[%s273_s1 + $0x38] sm:$0xff]  ;;  %v23_v14 = vld [vmem:[%s273_s1 + $0x40] sm:$0xff] }
   0x4   :  { %168 = vmatpush3.bf16.msra.mxu0 %v167_v5  ;;  %v176_v13 = vpack.c.bf16 %v22_v12, %v21_v11  ;;  %v24_v15 = vld [vmem:[%s273_s1 + $0x48] sm:$0xff]  ;;  %v25_v17 = vld [vmem:[%s273_s1 + $0x50] sm:$0xff]  ;;  %v26_v18 = vld [vmem:[%s273_s1 + $0x58] sm:$0xff] }
   0x5   :  { %169 = vmatprep.subr.bf16.mxu0 %v193_v0  ;;  %v179_v16 = vpack.c.bf16 %v24_v15, %v23_v14  ;;  %v182_v19 = vpack.c.bf16 %v26_v18, %v25_v17  ;;  %v27_v20 = vld [vmem:[%s273_s1 + $0x60] sm:$0xff]  ;;  %v28_v21 = vld [vmem:[%s273_s1 + $0x68] sm:$0xff]  ;;  %v29_v23 = vld [vmem:[%s273_s1 + $0x70] sm:$0xff] }
   0x6   :  { %v185_v22 = vpack.c.bf16 %v28_v21, %v27_v20  ;;  %v30_v24 = vld [vmem:[%s273_s1 + $0x78] sm:$0xff]  ;;  %v14_v26 = vld [vmem:[%s274_s0] sm:$0xff] }
   0x7   :  { %v188_v25 = vpack.c.bf16 %v30_v24, %v29_v23  ;;  %v113_v27 = vld [vmem:[%s275_s2] ss:$0 sm:$0xff] }
   0x8   :  { %171 = vmatpush3.bf16.msra.mxu0 %v170_v7 }
   0x9   :  { %172 = vmatprep.subr.bf16.mxu0 %v193_v0 }
   0xc   :  { %174 = vmatpush3.bf16.msra.mxu0 %v173_v10 }
   0xd   :  { %175 = vmatprep.subr.bf16.mxu0 %v193_v0 }
  0x10   :  { %177 = vmatpush3.bf16.msra.mxu0 %v176_v13 }
  0x11   :  { %178 = vmatprep.subr.bf16.mxu0 %v193_v0 }
  0x14   :  { %180 = vmatpush3.bf16.msra.mxu0 %v179_v16 }
  0x15   :  { %181 = vmatprep.subr.bf16.mxu0 %v193_v0 }
  0x18   :  { %183 = vmatpush3.bf16.msra.mxu0 %v182_v19 }
  0x19   :  { %184 = vmatprep.subr.bf16.mxu0 %v193_v0 }
  0x1c   :  { %186 = vmatpush3.bf16.msra.mxu0 %v185_v22 }
  0x1d   :  { %187 = vmatprep.subr.bf16.mxu0 %v193_v0 }
  0x20   :  { %189 = vmatpush3.bf16.msra.mxu0 %v188_v25 }
  0x23   :  { %164 = vmatmul.mubr.f32.vlgmr.msra.gmra.mrb[0].mxu0 %v14_v26 }
  0xf6   :  { %v104_v28 = vpop.f32.mrb[0].mxu0 }
  0xf7   :  { %v105_v29 = vadd.f32 %v113_v27, %v104_v28  ;;  %v165_v30 = vpop.f32.mrb[1].mxu0 }
  0xf9   :  { %108 = vst [vmem:[%s276_s3] sm:$0xff] %v105_v29 }

</bundles_post_ra>
